<compile_context>
chip_gen: v6e
topology: v6e:2x2x1
jax: 0.10.0
libtpu: 0.0.40
codegen_flags: <defaults>
</compile_context>

<pallas_src>
import jax
import jax.numpy as jnp
from jax import lax
from jax.experimental import pallas as pl
from jax.experimental.pallas import tpu as pltpu


# ----------------------------------------------------------------------------
# Kernel factory: whole MLP (n_linear layers + ReLUs + softmax) fused.
# Activations inside the kernel are feature-major: [features, batch_tile].
# refs = (x_ref, w0, b0, w1, b1, ..., w_last, b_last, out_ref)
# ----------------------------------------------------------------------------
def _make_mlp_kernel(n_linear, compute_dtype=jnp.bfloat16):
    def kernel(*refs):
        x_ref, out_ref = refs[0], refs[-1]
        p = refs[1:-1]                                   # w0,b0,w1,b1,...

        # Layer 0: x is batch-major (bn, num_inputs); contract its feature
        # axis (dim 1) against w0's input axis (dim 1) -> (hidden0, bn).
        w0, b0 = p[0], p[1]
        h = lax.dot_general(w0[...], x_ref[...],
                            dimension_numbers=(((1,), (1,)), ((), ())),
                            preferred_element_type=jnp.float32)
        h = jnp.maximum(h + b0[...], 0.0)                # bias/ReLU in f32

        # Hidden layers 1..n-2: feature-major matmuls on the MXU.
        for li in range(1, n_linear - 1):
            w, b = p[2 * li], p[2 * li + 1]
            h = jnp.dot(w[...], h.astype(compute_dtype),
                        preferred_element_type=jnp.float32)
            h = jnp.maximum(h + b[...], 0.0)

        # Output layer + softmax over the feature axis (== torch dim=-1).
        w, b = p[-2], p[-1]
        logits = jnp.dot(w[...], h.astype(compute_dtype),
                         preferred_element_type=jnp.float32) + b[...]
        m = jnp.max(logits, axis=0, keepdims=True)
        e = jnp.exp(logits - m)
        # Exact divide: softmax rows must sum to 1 (approx reciprocal did not).
        out_ref[...] = e / jnp.sum(e, axis=0, keepdims=True)

    return kernel


def _choose_block_batch(B, *, max_tile=1024, min_tiles=1):
    """Lane-aligned (x128) batch tile, as large as possible up to max_tile,
    split into at least `min_tiles` tiles (use min_tiles=2 on v7x so the
    'parallel' batch axis shards across both TensorCores)."""
    lanes = pl.cdiv(B, 128)                              # 128-lane groups
    per_tile = max(1, pl.cdiv(lanes, min_tiles))
    per_tile = min(per_tile, max(1, max_tile // 128))
    return 128 * per_tile


def double_q_learner_forward(x, params, *, max_tile=1024, min_tiles=1):
    """Fused MLP forward pass.

    x      : (B, num_inputs) float32, batch-major (same as the torch input).
    params : list of (W [out, in], b [out, 1]) float32 tuples.
    returns: (B, num_outputs) float32 softmax probabilities.
    """
    B, num_inputs = x.shape
    n_linear = len(params)
    num_outputs = params[-1][0].shape[0]

    block_batch = _choose_block_batch(B, max_tile=max_tile, min_tiles=min_tiles)
    grid_n = pl.cdiv(B, block_batch)
    padded_b = grid_n * block_batch

    # bf16 at the boundary: halves x's HBM bytes (dominant traffic) and keeps
    # the MXU on its native bf16 path.  Biases stay f32.
    x_in = x.astype(jnp.bfloat16)
    if padded_b != B:
        # Zero-pad the (at most 127) tail rows; padded softmax columns are
        # finite (zero logits) and sliced off below.
        x_in = jnp.pad(x_in, ((0, padded_b - B), (0, 0)))

    flat_params = []
    for w, b in params:
        flat_params.append(w.astype(jnp.bfloat16))       # [out, in]
        flat_params.append(b.astype(jnp.float32))        # [out, 1]

    # Constant block index -> weights/biases are DMA'd once and stay
    # VMEM-resident across all batch tiles.
    def const_spec(arr):
        return pl.BlockSpec(arr.shape, lambda i: (0, 0))

    in_specs = [pl.BlockSpec((block_batch, num_inputs), lambda i: (i, 0))]
    in_specs += [const_spec(a) for a in flat_params]
    out_spec = pl.BlockSpec((num_outputs, block_batch), lambda i: (0, i))

    # Advisory cost estimate so XLA can overlap this latency-bound call.
    dims = [num_inputs] + [w.shape[0] for w, _ in params]
    flops = 2 * B * sum(a * b for a, b in zip(dims[:-1], dims[1:]))
    param_bytes = sum(int(a.size) * a.dtype.itemsize for a in flat_params)
    bytes_accessed = (int(x_in.size) * x_in.dtype.itemsize
                      + padded_b * num_outputs * 4 + param_bytes)
    cost = pl.CostEstimate(flops=flops,
                           transcendentals=B * num_outputs,
                           bytes_accessed=bytes_accessed)

    out_t = pl.pallas_call(
        _make_mlp_kernel(n_linear, jnp.bfloat16),
        out_shape=jax.ShapeDtypeStruct((num_outputs, padded_b), jnp.float32),
        grid_spec=pltpu.PrefetchScalarGridSpec(
            num_scalar_prefetch=0,
            grid=(grid_n,),
            in_specs=in_specs,
            out_specs=out_spec,
        ),
        compiler_params=pltpu.CompilerParams(
            dimension_semantics=("parallel",)),
        cost_estimate=cost,
    )(x_in, *flat_params)

    # Drop batch padding; host transpose back to batch-major (16 B/sample).
    return out_t[:, :B].T


# ----------------------------------------------------------------------------
# Deterministic parameter init (Xavier-uniform weights, zero biases), matching
# the module's initialize_weights.  Weights are torch-native [out, in].
# ----------------------------------------------------------------------------
def init_params(key, num_inputs, neurons, num_outputs):
    dims = [num_inputs] + list(neurons) + [num_outputs]
    params = []
    for fan_in, fan_out in zip(dims[:-1], dims[1:]):
        key, sub = jax.random.split(key)
        bound = jnp.sqrt(6.0 / (fan_in + fan_out))
        w = jax.random.uniform(sub, (fan_out, fan_in), jnp.float32,
                               minval=-bound, maxval=bound)
        b = jnp.zeros((fan_out, 1), jnp.float32)
        params.append((w, b))
    return params


# Pure-JAX f32 reference (batch-major) for a correctness sanity check.
def reference_forward(x, params):
    h = x
    for w, b in params[:-1]:
        h = jnp.maximum(h @ w.T + b.T, 0.0)
    w, b = params[-1]
    return jax.nn.softmax(h @ w.T + b.T, axis=-1)


if __name__ == "__main__":
    # Module config: num_layers=3, neurons=[32, 32, 32], num_inputs=8, num_outputs=4
    neurons = [32, 32, 32]
    num_inputs = 8
    num_outputs = 4
    batch = 300   # not a multiple of 128 -> exercises tail padding

    key = jax.random.PRNGKey(0)
    key, xkey = jax.random.split(key)
    x = jax.random.normal(xkey, (batch, num_inputs), jnp.float32)
    params = init_params(key, num_inputs, neurons, num_outputs)

    out = double_q_learner_forward(x, params)   # min_tiles=2 on v7x (2 TCs)
    out = jax.block_until_ready(out)

    ref = reference_forward(x, params)
    assert out.shape == (batch, num_outputs)
    # bf16 inputs/weights -> compare against the f32 reference loosely.
    assert jnp.allclose(out, ref, atol=2e-2, rtol=2e-2), "mismatch vs f32 reference"
    # Exact divide in the kernel -> softmax rows sum to 1 to f32 precision.
    assert jnp.allclose(jnp.sum(out, axis=-1), jnp.ones((batch,)), atol=1e-5), \
        "softmax rows do not sum to 1"

    # TODO(synk): Adam optimizer / StepLR scheduler / train_q_learner loop and
    # the torch DataLoader wrapping are host-side concerns, not forward-pass ops.
    print("KERNEL_OK")
</pallas_src>

<mosaic_0001>
module attributes {stable_mosaic.version = 11 : i64} {
  func.func @kernel(%arg0: i32, %arg1: memref<384x8xbf16, #tpu.memory_space<vmem>>, %arg2: memref<32x8xbf16, #tpu.memory_space<vmem>>, %arg3: memref<32x1xf32, #tpu.memory_space<vmem>>, %arg4: memref<32x32xbf16, #tpu.memory_space<vmem>>, %arg5: memref<32x1xf32, #tpu.memory_space<vmem>>, %arg6: memref<32x32xbf16, #tpu.memory_space<vmem>>, %arg7: memref<32x1xf32, #tpu.memory_space<vmem>>, %arg8: memref<4x32xbf16, #tpu.memory_space<vmem>>, %arg9: memref<4x1xf32, #tpu.memory_space<vmem>>, %arg10: memref<4x384xf32, #tpu.memory_space<vmem>>) attributes {dimension_semantics = [#tpu.dimension_semantics<parallel>], iteration_bounds = array<i64: 1>, scalar_prefetch = 0 : i64, scratch_operands = 0 : i64, tpu.core_type = #tpu.core_type<tc>, window_params = [{transform_indices = @transform_0, window_bounds = array<i64: 384, 8>}, {pipeline_mode = #tpu.pipeline_mode<synchronous>, transform_indices = @transform_1, window_bounds = array<i64: 32, 8>}, {pipeline_mode = #tpu.pipeline_mode<synchronous>, transform_indices = @transform_2, window_bounds = array<i64: 32, 1>}, {pipeline_mode = #tpu.pipeline_mode<synchronous>, transform_indices = @transform_3, window_bounds = array<i64: 32, 32>}, {pipeline_mode = #tpu.pipeline_mode<synchronous>, transform_indices = @transform_4, window_bounds = array<i64: 32, 1>}, {pipeline_mode = #tpu.pipeline_mode<synchronous>, transform_indices = @transform_5, window_bounds = array<i64: 32, 32>}, {pipeline_mode = #tpu.pipeline_mode<synchronous>, transform_indices = @transform_6, window_bounds = array<i64: 32, 1>}, {pipeline_mode = #tpu.pipeline_mode<synchronous>, transform_indices = @transform_7, window_bounds = array<i64: 4, 32>}, {pipeline_mode = #tpu.pipeline_mode<synchronous>, transform_indices = @transform_8, window_bounds = array<i64: 4, 1>}, {transform_indices = @transform_9, window_bounds = array<i64: 4, 384>}]} {
    %c0 = arith.constant 0 : index
    %c0_0 = arith.constant 0 : index
    %0 = vector.load %arg2[%c0, %c0_0] : memref<32x8xbf16, #tpu.memory_space<vmem>>, vector<32x8xbf16>
    %c0_1 = arith.constant 0 : index
    %c0_2 = arith.constant 0 : index
    %1 = vector.load %arg1[%c0_1, %c0_2] : memref<384x8xbf16, #tpu.memory_space<vmem>>, vector<384x8xbf16>
    %cst = arith.constant dense<0.000000e+00> : vector<32x384xf32>
    %2 = tpu.matmul %0, %1, %cst {dimension_numbers = #tpu.dot_dimension_numbers<[1], [1], [0], [0], [0, 0, 1, 0], [], []>} : vector<32x8xbf16>, vector<384x8xbf16>, vector<32x384xf32> -> vector<32x384xf32>
    %c0_3 = arith.constant 0 : index
    %c0_4 = arith.constant 0 : index
    %3 = vector.load %arg3[%c0_3, %c0_4] : memref<32x1xf32, #tpu.memory_space<vmem>>, vector<32x1xf32>
    %4 = vector.broadcast %3 : vector<32x1xf32> to vector<32x384xf32>
    %5 = arith.addf %2, %4 : vector<32x384xf32>
    %cst_5 = arith.constant 0.000000e+00 : f32
    %6 = vector.broadcast %cst_5 : f32 to vector<32x384xf32>
    %7 = arith.maximumf %5, %6 : vector<32x384xf32>
    %c0_6 = arith.constant 0 : index
    %c0_7 = arith.constant 0 : index
    %8 = vector.load %arg4[%c0_6, %c0_7] : memref<32x32xbf16, #tpu.memory_space<vmem>>, vector<32x32xbf16>
    %9 = arith.truncf %7 : vector<32x384xf32> to vector<32x384xbf16>
    %cst_8 = arith.constant dense<0.000000e+00> : vector<32x384xf32>
    %10 = tpu.matmul %8, %9, %cst_8 {dimension_numbers = #tpu.dot_dimension_numbers<[1], [0], [0], [1], [0, 0, 1, 1], [], []>} : vector<32x32xbf16>, vector<32x384xbf16>, vector<32x384xf32> -> vector<32x384xf32>
    %c0_9 = arith.constant 0 : index
    %c0_10 = arith.constant 0 : index
    %11 = vector.load %arg5[%c0_9, %c0_10] : memref<32x1xf32, #tpu.memory_space<vmem>>, vector<32x1xf32>
    %12 = vector.broadcast %11 : vector<32x1xf32> to vector<32x384xf32>
    %13 = arith.addf %10, %12 : vector<32x384xf32>
    %cst_11 = arith.constant 0.000000e+00 : f32
    %14 = vector.broadcast %cst_11 : f32 to vector<32x384xf32>
    %15 = arith.maximumf %13, %14 : vector<32x384xf32>
    %c0_12 = arith.constant 0 : index
    %c0_13 = arith.constant 0 : index
    %16 = vector.load %arg6[%c0_12, %c0_13] : memref<32x32xbf16, #tpu.memory_space<vmem>>, vector<32x32xbf16>
    %17 = arith.truncf %15 : vector<32x384xf32> to vector<32x384xbf16>
    %cst_14 = arith.constant dense<0.000000e+00> : vector<32x384xf32>
    %18 = tpu.matmul %16, %17, %cst_14 {dimension_numbers = #tpu.dot_dimension_numbers<[1], [0], [0], [1], [0, 0, 1, 1], [], []>} : vector<32x32xbf16>, vector<32x384xbf16>, vector<32x384xf32> -> vector<32x384xf32>
    %c0_15 = arith.constant 0 : index
    %c0_16 = arith.constant 0 : index
    %19 = vector.load %arg7[%c0_15, %c0_16] : memref<32x1xf32, #tpu.memory_space<vmem>>, vector<32x1xf32>
    %20 = vector.broadcast %19 : vector<32x1xf32> to vector<32x384xf32>
    %21 = arith.addf %18, %20 : vector<32x384xf32>
    %cst_17 = arith.constant 0.000000e+00 : f32
    %22 = vector.broadcast %cst_17 : f32 to vector<32x384xf32>
    %23 = arith.maximumf %21, %22 : vector<32x384xf32>
    %c0_18 = arith.constant 0 : index
    %c0_19 = arith.constant 0 : index
    %24 = vector.load %arg8[%c0_18, %c0_19] : memref<4x32xbf16, #tpu.memory_space<vmem>>, vector<4x32xbf16>
    %25 = arith.truncf %23 : vector<32x384xf32> to vector<32x384xbf16>
    %cst_20 = arith.constant dense<0.000000e+00> : vector<4x384xf32>
    %26 = tpu.matmul %24, %25, %cst_20 {dimension_numbers = #tpu.dot_dimension_numbers<[1], [0], [0], [1], [0, 0, 1, 1], [], []>} : vector<4x32xbf16>, vector<32x384xbf16>, vector<4x384xf32> -> vector<4x384xf32>
    %c0_21 = arith.constant 0 : index
    %c0_22 = arith.constant 0 : index
    %27 = vector.load %arg9[%c0_21, %c0_22] : memref<4x1xf32, #tpu.memory_space<vmem>>, vector<4x1xf32>
    %28 = vector.broadcast %27 : vector<4x1xf32> to vector<4x384xf32>
    %29 = arith.addf %26, %28 : vector<4x384xf32>
    %cst_23 = arith.constant dense<0xFF800000> : vector<384xf32>
    %30 = vector.multi_reduction <maximumf>, %29, %cst_23 [0] : vector<4x384xf32> to vector<384xf32>
    %31 = vector.shape_cast %30 : vector<384xf32> to vector<1x384xf32>
    %32 = vector.broadcast %31 : vector<1x384xf32> to vector<4x384xf32>
    %33 = arith.subf %29, %32 : vector<4x384xf32>
    %34 = math.exp %33 : vector<4x384xf32>
    %cst_24 = arith.constant dense<0.000000e+00> : vector<384xf32>
    %35 = vector.multi_reduction <add>, %34, %cst_24 [0] : vector<4x384xf32> to vector<384xf32>
    %36 = vector.shape_cast %35 : vector<384xf32> to vector<1x384xf32>
    %37 = vector.broadcast %36 : vector<1x384xf32> to vector<4x384xf32>
    %38 = arith.divf %34, %37 : vector<4x384xf32>
    %c0_25 = arith.constant 0 : index
    %c0_26 = arith.constant 0 : index
    %39 = vector.load %arg10[%c0_25, %c0_26] : memref<4x384xf32, #tpu.memory_space<vmem>>, vector<4x384xf32>
    tpu.vector_store %arg10[%c0_25, %c0_26], %38 {strides = array<i32>} : memref<4x384xf32, #tpu.memory_space<vmem>>, vector<4x384xf32>,
    return
  }
  func.func @transform_0(%arg0: i32) -> (i32, i32) {
    %c0_i32 = arith.constant 0 : i32
    %c0_i32_0 = arith.constant 0 : i32
    return %arg0, %c0_i32 : i32, i32
  }
  func.func @transform_1(%arg0: i32) -> (i32, i32) {
    %c0_i32 = arith.constant 0 : i32
    %c0_i32_0 = arith.constant 0 : i32
    %c0_i32_1 = arith.constant 0 : i32
    return %c0_i32, %c0_i32_0 : i32, i32
  }
  func.func @transform_2(%arg0: i32) -> (i32, i32) {
    %c0_i32 = arith.constant 0 : i32
    %c0_i32_0 = arith.constant 0 : i32
    %c0_i32_1 = arith.constant 0 : i32
    return %c0_i32, %c0_i32_0 : i32, i32
  }
  func.func @transform_3(%arg0: i32) -> (i32, i32) {
    %c0_i32 = arith.constant 0 : i32
    %c0_i32_0 = arith.constant 0 : i32
    %c0_i32_1 = arith.constant 0 : i32
    return %c0_i32, %c0_i32_0 : i32, i32
  }
  func.func @transform_4(%arg0: i32) -> (i32, i32) {
    %c0_i32 = arith.constant 0 : i32
    %c0_i32_0 = arith.constant 0 : i32
    %c0_i32_1 = arith.constant 0 : i32
    return %c0_i32, %c0_i32_0 : i32, i32
  }
  func.func @transform_5(%arg0: i32) -> (i32, i32) {
    %c0_i32 = arith.constant 0 : i32
    %c0_i32_0 = arith.constant 0 : i32
    %c0_i32_1 = arith.constant 0 : i32
    return %c0_i32, %c0_i32_0 : i32, i32
  }
  func.func @transform_6(%arg0: i32) -> (i32, i32) {
    %c0_i32 = arith.constant 0 : i32
    %c0_i32_0 = arith.constant 0 : i32
    %c0_i32_1 = arith.constant 0 : i32
    return %c0_i32, %c0_i32_0 : i32, i32
  }
  func.func @transform_7(%arg0: i32) -> (i32, i32) {
    %c0_i32 = arith.constant 0 : i32
    %c0_i32_0 = arith.constant 0 : i32
    %c0_i32_1 = arith.constant 0 : i32
    return %c0_i32, %c0_i32_0 : i32, i32
  }
  func.func @transform_8(%arg0: i32) -> (i32, i32) {
    %c0_i32 = arith.constant 0 : i32
    %c0_i32_0 = arith.constant 0 : i32
    %c0_i32_1 = arith.constant 0 : i32
    return %c0_i32, %c0_i32_0 : i32, i32
  }
  func.func @transform_9(%arg0: i32) -> (i32, i32) {
    %c0_i32 = arith.constant 0 : i32
    %c0_i32_0 = arith.constant 0 : i32
    return %c0_i32, %arg0 : i32, i32
  }
}

</mosaic_0001>

<bundles_post_ra>
// kernel: tpu_custom_call.1
= control target key start
LH: loop header
LB: loop body
LE: loop exit
PB: predicated region body
PF: predicated region fallthrough
CT: control target
= control target key end

     0   :  { %vm240_vm0 = vcmask 64512   ;;  %v1152_v3 = vmov 0   ;;  %s1407_s0 = inlined_call_operand.vmem [shape: bf16[384,8], index: 0, kind: input, shape index: {}]   ;;  %s1408_s1 = inlined_call_operand.vmem [shape: bf16[32,8], index: 1, kind: input, shape index: {}]   ;;  %s1409_s2 = inlined_call_operand.vmem [shape: f32[32,1], index: 2, kind: input, shape index: {}]   ;;  %s1410_s3 = inlined_call_operand.vmem [shape: bf16[32,32], index: 3, kind: input, shape index: {}]   ;;  %s1411_s4 = inlined_call_operand.vmem [shape: f32[32,1], index: 4, kind: input, shape index: {}]   ;;  %s1412_s5 = inlined_call_operand.vmem [shape: bf16[32,32], index: 5, kind: input, shape index: {}]   ;;  %s1413_s6 = inlined_call_operand.vmem [shape: f32[32,1], index: 6, kind: input, shape index: {}]   ;;  %s1414_s7 = inlined_call_operand.vmem [shape: bf16[4,32], index: 7, kind: input, shape index: {}]   ;;  %s1415_s8 = inlined_call_operand.vmem [shape: f32[4,1], index: 8, kind: input, shape index: {}]   ;;  %s1416_s9 = inlined_call_operand.hbm [shape: f32[4,384], index: 9, kind: output, shape index: {}]  }
   0x1   :  { %v1088_v0 = vld [vmem:[%s1407_s0 + $0x78] sm:$0xff]   ;;  %1086 = vset.pattern.permute.xlu0 %v1152_v3  ;;  %v1091_v5 = vld [vmem:[%s1407_s0 + $0x70] sm:$0xff]   ;;  %1087 = vset.pattern.permute.xlu1 %v1152_v3  ;;  %v1095_v10 = vld [vmem:[%s1407_s0 + $0xa8] sm:$0xff]  }
   0x2   :  { %v1089_v1 = vld [vmem:[%s1407_s0 + $0xb8] sm:$0xff]   ;;  %1066 = vmatprep.subr.msk.bf16.mxu0 %vm240_vm0, %v1088_v0  ;;  %v1092_v7 = vld [vmem:[%s1407_s0 + $0xb0] sm:$0xff]   ;;  %v1094_v12 = vld [vmem:[%s1407_s0 + $0x68] sm:$0xff]   ;;  %v311_v14 = vsel %vm240_vm0, %v1095_v10, 0 }
   0x3   :  { %v1090_v2 = vld [vmem:[%s1407_s0 + $0x38] sm:$0xff]   ;;  %1074 = vmatprep.subr.msk.bf16.mxu1 %vm240_vm0, %v1089_v1  ;;  %v317_v4 = vsel %vm240_vm0, %v1089_v1, 0  ;;  %v1093_v8 = vld [vmem:[%s1407_s0 + $0x30] sm:$0xff]   ;;  %v314_v9 = vsel %vm240_vm0, %v1092_v7, 0  ;;  %v1096_v13 = vld [vmem:[%s1407_s0 + $0x28] sm:$0xff]  }
   0x4   :  { %v269_v6 = vsel %vm240_vm0, %v1090_v2, 0  ;;  %1023 = vmatpush3.bf16.xpose.msra.mxu1 %v317_v4  ;;  %v266_v11 = vsel %vm240_vm0, %v1093_v8, 0  ;;  %v1098_v15 = vld [vmem:[%s1407_s0 + $0xa0] sm:$0xff]   ;;  %v263_v16 = vsel %vm240_vm0, %v1096_v13, 0  ;;  %v1101_v21 = vld [vmem:[%s1407_s0 + $0x98] sm:$0xff]   ;;  %v88_v24 = vld [vmem:[%s1409_s2 + $0x10] sm:$0xff] }
   0x5   :  { %982 = vmatpush3.bf16.xpose.msra.mxu0 %v269_v6  ;;  %1075 = vmatprep.subr.msk.bf16.mxu1 %vm240_vm0, %v1092_v7  ;;  %v1097_v17 = vld [vmem:[%s1407_s0 + $0x60] sm:$0xff]   ;;  %v308_v20 = vsel %vm240_vm0, %v1098_v15, 0  ;;  %v1100_v23 = vld [vmem:[%s1407_s0 + $0x58] sm:$0xff]   ;;  %v87_v28 = vld [vmem:[%s1409_s2 + $0x8] sm:$0xff]  ;;  %v305_v30 = vsel %vm240_vm0, %v1101_v21, 0 }
   0x6   :  { %1067 = vmatprep.subr.msk.bf16.mxu0 %vm240_vm0, %v1091_v5  ;;  %v1099_v18 = vld [vmem:[%s1407_s0 + $0x20] sm:$0xff]   ;;  %102 = vperm.xlu0 %1086, %v88_v24   ;;  %v89_v26 = vld [vmem:[%s1409_s2 + $0x18] sm:$0xff]  ;;  %v445_v29 = vld [vmem:[%s1411_s4 + $0x10] sm:$0xff] }
   0x7   :  { %v1261_v19 = vld [vmem:[%s1408_s1] sm:$0xff]   ;;  %v260_v22 = vsel %vm240_vm0, %v1099_v18, 0  ;;  %v1102_v27 = vld [vmem:[%s1407_s0 + $0x18] sm:$0xff]   ;;  %v1104_v31 = vld [vmem:[%s1407_s0 + $0x90] sm:$0xff]  }
   0x8   :  { %997 = vmatprep.mubr.msk.bf16.mxu0 %vm240_vm0, %v1261_v19  ;;  %1038 = vmatprep.mubr.msk.bf16.mxu1 %vm240_vm0, %v1261_v19  ;;  %v86_v25 = vld [vmem:[%s1409_s2] sm:$0xff]  ;;  %v446_v32 = vld [vmem:[%s1411_s4 + $0x18] sm:$0xff] }
   0x9   :  { %92 = vperm.xlu1 %1087, %v86_v25  }
   0xa   :  { %107 = vperm.xlu0 %1086, %v89_v26  }
   0xc   :  { %1025 = vmatpush3.bf16.xpose.msra.mxu1 %v314_v9 }
   0xd   :  { %984 = vmatpush3.bf16.xpose.msra.mxu0 %v266_v11  ;;  %1076 = vmatprep.subr.msk.bf16.mxu1 %vm240_vm0, %v1095_v10 }
   0xe   :  { %1068 = vmatprep.subr.msk.bf16.mxu0 %vm240_vm0, %v1094_v12  ;;  %97 = vperm.xlu1 %1087, %v87_v28  }
  0x14   :  { %1027 = vmatpush3.bf16.xpose.msra.mxu1 %v311_v14 }
  0x15   :  { %986 = vmatpush3.bf16.xpose.msra.mxu0 %v263_v16  ;;  %1077 = vmatprep.subr.msk.bf16.mxu1 %vm240_vm0, %v1098_v15 }
  0x16   :  { %1069 = vmatprep.subr.msk.bf16.mxu0 %vm240_vm0, %v1097_v17 }
  0x1c   :  { %1029 = vmatpush3.bf16.xpose.msra.mxu1 %v308_v20 }
  0x1d   :  { %988 = vmatpush3.bf16.xpose.msra.mxu0 %v260_v22  ;;  %1078 = vmatprep.subr.msk.bf16.mxu1 %vm240_vm0, %v1101_v21 }
  0x1e   :  { %1070 = vmatprep.subr.msk.bf16.mxu0 %vm240_vm0, %v1100_v23 }
  0x1f   :  { %14 = vsyncpa [#allocation3], 0  ;;  %v257_v33 = vsel %vm240_vm0, %v1102_v27, 0  ;;  %v1103_v34 = vld [vmem:[%s1407_s0 + $0x50] sm:$0xff]   ;;  %459 = vperm.xlu0 %1086, %v445_v29   ;;  %v443_v35 = vld [vmem:[%s1411_s4] sm:$0xff]  ;;  %464 = vperm.xlu1 %1087, %v446_v32   ;;  %v302_v39 = vsel %vm240_vm0, %v1104_v31, 0 }
  0x20   :  { %v444_v36 = vld [vmem:[%s1411_s4 + $0x8] sm:$0xff]  ;;  %v1105_v37 = vld [vmem:[%s1407_s0 + $0x10] sm:$0xff]   ;;  %v611_v41 = vld [vmem:[%s1413_s6 + $0x18] sm:$0xff]  ;;  %vm477_vm1 = vcmask 261120   ;;  %vm1154_vm2 = vmmov 0   ;;  %vm859_vm3 = vcmask 1043456  }
  0x21   :  { %v610_v38 = vld [vmem:[%s1413_s6 + $0x10] sm:$0xff]  ;;  %v1107_v40 = vld [vmem:[%s1407_s0 + $0x88] sm:$0xff]   ;;  %v254_v42 = vsel %vm240_vm0, %v1105_v37, 0  ;;  %v608_v44 = vld [vmem:[%s1413_s6] sm:$0xff] }
  0x22   :  { %v1106_v43 = vld [vmem:[%s1407_s0 + $0x48] sm:$0xff]   ;;  %v769_v47 = vld [vmem:[%s1415_s8] sm:$0xf]  ;;  %v299_v48 = vsel %vm240_vm0, %v1107_v40, 0 }
  0x23   :  { %449 = vperm.xlu0 %1086, %v443_v35   ;;  %454 = vperm.xlu1 %1087, %v444_v36   ;;  %v609_v45 = vld [vmem:[%s1413_s6 + $0x8] sm:$0xff]  ;;  %v1110_v49 = vld [vmem:[%s1407_s0 + $0x80] sm:$0xff]  }
  0x24   :  { %1031 = vmatpush3.bf16.xpose.msra.mxu1 %v305_v30  ;;  %v1108_v46 = vld [vmem:[%s1407_s0 + $0x8] sm:$0xff]   ;;  %v1109_v51 = vld [vmem:[%s1407_s0 + $0x40] sm:$0xff]   ;;  %v296_v53 = vsel %vm240_vm0, %v1110_v49, 0 }
  0x25   :  { %990 = vmatpush3.bf16.xpose.msra.mxu0 %v257_v33  ;;  %1079 = vmatprep.subr.msk.bf16.mxu1 %vm240_vm0, %v1104_v31  ;;  %v251_v50 = vsel %vm240_vm0, %v1108_v46, 0  ;;  %v1111_v52 = vld [vmem:[%s1407_s0] sm:$0xff]   ;;  %v1113_v55 = vld [vmem:[%s1408_s1 + $0x8] sm:$0xff]  }
  0x26   :  { %1071 = vmatprep.subr.msk.bf16.mxu0 %vm240_vm0, %v1103_v34  ;;  %v248_v54 = vsel %vm240_vm0, %v1111_v52, 0  ;;  %v1114_v56 = vld [vmem:[%s1410_s3] sm:$0xff]   ;;  %v1115_v24 = vld [vmem:[%s1410_s3 + $0x8] sm:$0xff]  }
  0x27   :  { %624 = vperm.xlu0 %1086, %v610_v38   ;;  %629 = vperm.xlu1 %1087, %v611_v41   ;;  %v1116_v41 = vld [vmem:[%s1412_s5] sm:$0xff]  }
  0x2b   :  { %614 = vperm.xlu0 %1086, %v608_v44   ;;  %619 = vperm.xlu1 %1087, %v609_v45  }
  0x2c   :  { %1033 = vmatpush3.bf16.xpose.msra.mxu1 %v302_v39 }
  0x2d   :  { %992 = vmatpush3.bf16.xpose.msra.mxu0 %v254_v42  ;;  %1080 = vmatprep.subr.msk.bf16.mxu1 %vm240_vm0, %v1107_v40 }
  0x2e   :  { %1072 = vmatprep.subr.msk.bf16.mxu0 %vm240_vm0, %v1106_v43 }
  0x2f   :  { %772 = vperm.xlu0 %1086, %v769_v47  }
  0x34   :  { %1035 = vmatpush3.bf16.xpose.msra.mxu1 %v299_v48 }
  0x35   :  { %994 = vmatpush3.bf16.xpose.msra.mxu0 %v251_v50  ;;  %1081 = vmatprep.subr.msk.bf16.mxu1 %vm240_vm0, %v1110_v49 }
  0x36   :  { %1073 = vmatprep.subr.msk.bf16.mxu0 %vm240_vm0, %v1109_v51 }
  0x3c   :  { %1037 = vmatpush3.bf16.xpose.msra.mxu1 %v296_v53 }
  0x3d   :  { %996 = vmatpush3.bf16.xpose.msra.mxu0 %v248_v54 }
  0x43   :  { %1039 = vmatmul.mubr.msk.bf16.vlgmr.msra.gmra.mxu1 %vm240_vm0, %v1113_v55 }
  0x44   :  { %998 = vmatmul.mubr.msk.bf16.vlgmr.msra.gmra.mxu0 %vm240_vm0, %v1261_v19  ;;  %516 = vmatprep.mubr.bf16.mxu1 %v1152_v3 }
  0x45   :  { %999 = vmatprep.mubr.msk.bf16.mxu0 %vm240_vm0, %v1113_v55 }
  0x4c   :  { %1000 = vmatmul.mubr.msk.bf16.gmra.mxu0 %vm240_vm0, %v1113_v55 }
  0x4d   :  { %1046 = vmatprep.mubr.msk.bf16.mxu0 %vm477_vm1, %v1114_v56 }
  0x81   :  { %v103_v57 = vpop.permute.xlu0 %102 }
  0x84   :  { %v93_v58 = vpop.permute.xlu1 %92 }
  0x85   :  { %v108_v1 = vpop.permute.xlu0 %107 }
  0x89   :  { %v98_v7 = vpop.permute.xlu1 %97 }
  0x9a   :  { %v460_v42 = vpop.permute.xlu0 %459  ;;  %v465_v43 = vpop.permute.xlu1 %464 }
  0x9e   :  { %v450_v47 = vpop.permute.xlu0 %449  ;;  %v455_v51 = vpop.permute.xlu1 %454 }
 0x103   :  { %v1040_v59 = vpop.f32.mrf.mxu1 }
 0x104   :  { %v353_v60 = vpop.f32.mrf.mxu0  ;;  %v415_v61 = vadd.f32 %v1040_v59, %v103_v57 }
 0x105   :  { %v406_v62 = vpop.f32.mrf.mxu1  ;;  %v354_v32 = vadd.f32 %v353_v60, %v93_v58 }
 0x106   :  { %v355_v63 = vpop.f32.mrf.mxu0  ;;  %v407_v0 = vadd.f32 %v406_v62, %v93_v58  ;;  %v429_v4 = vmax.f32 %v415_v61, 0.0 }
 0x107   :  { %v1041_v2 = vpop.f32.mrf.mxu1  ;;  %v356_v25 = vadd.f32 %v355_v63, %v93_v58  ;;  %v421_v39 = vmax.f32 %v354_v32, 0.0  ;;  %v1117_v63 = vld [vmem:[%s1412_s5 + $0x8] sm:$0xff]  }
 0x108   :  { %v357_v5 = vpop.f32.mrf.mxu0  ;;  %v418_v6 = vadd.f32 %v1041_v2, %v108_v1  ;;  %v423_v9 = vmax.f32 %v407_v0, 0.0 }
 0x109   :  { %v409_v8 = vpop.f32.mrf.mxu1  ;;  %v358_v27 = vadd.f32 %v357_v5, %v98_v7  ;;  %v422_v34 = vmax.f32 %v356_v25, 0.0 }
 0x10a   :  { %v432_v10 = vmax.f32 %v418_v6, 0.0  ;;  %v359_v11 = vpop.f32.mrf.mxu0  ;;  %v410_v12 = vadd.f32 %v409_v8, %v98_v7 }
 0x10b   :  { %v360_v19 = vadd.f32 %v359_v11, %v98_v7  ;;  %v424_v36 = vmax.f32 %v358_v27, 0.0  ;;  %v625_v27 = vpop.permute.xlu0 %624 }
 0x10c   :  { %v442_v13 = vpack.c.bf16 %v432_v10, %v429_v4  ;;  %v363_v14 = vpop.f32.mrf.mxu0  ;;  %v426_v15 = vmax.f32 %v410_v12, 0.0 }
 0x10d   :  { %v364_v22 = vadd.f32 %v363_v14, %v103_v57  ;;  %v425_v29 = vmax.f32 %v360_v19, 0.0  ;;  %v437_v40 = vpack.c.bf16 %v424_v36, %v421_v39 }
 0x10e   :  { %v439_v16 = vpack.c.bf16 %v426_v15, %v423_v9  ;;  %v365_v17 = vpop.f32.mrf.mxu0  ;;  %1042 = vmatprep.subr.bf16.mxu0 %v442_v13 }
 0x10f   :  { %1043 = vmatpush3.bf16.msra.mxu0 %v442_v13  ;;  %v366_v20 = vadd.f32 %v365_v17, %v103_v57  ;;  %v427_v33 = vmax.f32 %v364_v22, 0.0  ;;  %v438_v38 = vpack.c.bf16 %v425_v29, %v422_v34 }
 0x110   :  { %v367_v18 = vpop.f32.mrf.mxu0  ;;  %1044 = vmatprep.subr.bf16.mxu0 %v439_v16 }
 0x111   :  { %v368_v21 = vadd.f32 %v367_v18, %v108_v1  ;;  %v428_v30 = vmax.f32 %v366_v20, 0.0 }
 0x112   :  { %v369_v23 = vpop.f32.mrf.mxu0 }
 0x113   :  { %v370_v26 = vadd.f32 %v369_v23, %v108_v1  ;;  %1045 = vmatpush3.bf16.msra.mxu0 %v439_v16  ;;  %v430_v28 = vmax.f32 %v368_v21, 0.0 }
 0x115   :  { %v431_v31 = vmax.f32 %v370_v26, 0.0  ;;  %v440_v37 = vpack.c.bf16 %v430_v28, %v427_v33  ;;  %v1153_v26 = vmov 0.0   ;;  %v630_v28 = vpop.permute.xlu1 %629  ;;  %v615_v33 = vpop.permute.xlu0 %614 }
 0x116   :  { %1047 = vmatmul.mubr.msk.bf16.vlgmr.msra.gmra.mxu0 %vm477_vm1, %v1115_v24 }
 0x117   :  { %v441_v35 = vpack.c.bf16 %v431_v31, %v428_v30  ;;  %680 = vmatprep.mubr.bf16.mxu0 %v1152_v3 }
 0x119   :  { %496 = vmatprep.subr.bf16.mxu1 %v441_v35  ;;  %v620_v35 = vpop.permute.xlu1 %619 }
 0x11a   :  { %497 = vmatpush1.bf16.msra.mxu1 %v440_v37 }
 0x11b   :  { %498 = vmatprep.subr.bf16.mxu1 %v438_v38 }
 0x11e   :  { %499 = vmatpush1.bf16.msra.mxu1 %v437_v40 }
 0x121   :  { %969 = vmatmul.mubr.msk.bf16.vlgmr.msra.gmra.mxu1 %vm477_vm1, %v1114_v56 }
 0x122   :  { %526 = vmatprep.mubr.bf16.mxu1 %v1152_v3 }
 0x129   :  { %970 = vmatmul.mubr.msk.bf16.gmra.mxu1 %vm477_vm1, %v1115_v24 }
 0x12a   :  { %1054 = vmatprep.mubr.msk.bf16.mxu1 %vm477_vm1, %v1116_v41 }
 0x1d6   :  { %v1048_v44 = vpop.f32.mrf.mxu0 }
 0x1d7   :  { %v580_v46 = vadd.f32 %v1048_v44, %v460_v42  ;;  %v762_v44 = vld [vmem:[%s1414_s7] sm:$0x3]  ;;  %s1155_s7 = smov [#allocation2]  }
 0x1d8   :  { %v571_v45 = vpop.f32.mrf.mxu0  ;;  %s929_s4 = sshll.u32 %s1155_s7, 4  ;;  %s930_s4 = int_to_ptr.vmem [resolvable:$true] %s929_s4 }
 0x1d9   :  { %v572_v49 = vadd.f32 %v571_v45, %v450_v47  ;;  %v594_v53 = vmax.f32 %v580_v46, 0.0  ;;  %s1130_s25 = scalar_lea.vmem %s930_s4, 192  ;;  %p1135_p1 = scmp.lt.s32.totalorder %s930_s4, %s930_s4 }
 0x1da   :  { %v1049_v48 = vpop.f32.mrf.mxu0  ;;  %p1131_p0 = scmp.ne.s32.totalorder %s930_s4, %s1130_s25  ;;  %p1136_p2 = scmp.lt.s32.totalorder %s1130_s25, %s1130_s25 }
 0x1db   :  { %v583_v50 = vadd.f32 %v1049_v48, %v465_v43  ;;  %v588_v56 = vmax.f32 %v572_v49, 0.0 }
 0x1dc   :  { %v574_v52 = vpop.f32.mrf.mxu0  ;;  %p1137_p3 = por %p1136_p2, %p1135_p1 }
 0x1dd   :  { %v597_v54 = vmax.f32 %v583_v50, 0.0  ;;  %v575_v55 = vadd.f32 %v574_v52, %v455_v51 }
 0x1de   :  { %p1138_p4 = pnand %p1137_p3, %p1131_p0 }
 0x1df   :  { %v607_v57 = vpack.c.bf16 %v597_v54, %v594_v53  ;;  %v591_v58 = vmax.f32 %v575_v55, 0.0 }
 0x1e1   :  { %v604_v59 = vpack.c.bf16 %v591_v58, %v588_v56  ;;  %v518_v60 = vpop.f32.mrf.mxu1  ;;  %1050 = vmatprep.subr.bf16.mxu1 %v607_v57 }
 0x1e2   :  { %1051 = vmatpush3.bf16.msra.mxu1 %v607_v57  ;;  %v519_v17 = vadd.f32 %v518_v60, %v450_v47 }
 0x1e3   :  { %v520_v61 = vpop.f32.mrf.mxu1  ;;  %1052 = vmatprep.subr.bf16.mxu1 %v604_v59 }
 0x1e4   :  { %v521_v10 = vadd.f32 %v520_v61, %v450_v47  ;;  %v586_v24 = vmax.f32 %v519_v17, 0.0 }
 0x1e5   :  { %v522_v62 = vpop.f32.mrf.mxu1 }
 0x1e6   :  { %1053 = vmatpush3.bf16.msra.mxu1 %v604_v59  ;;  %v523_v12 = vadd.f32 %v522_v62, %v455_v51  ;;  %v587_v19 = vmax.f32 %v521_v10, 0.0  ;;  %v773_v10 = vpop.permute.xlu0 %772 }
 0x1e7   :  { %v524_v0 = vpop.f32.mrf.mxu1 }
 0x1e8   :  { %v525_v5 = vadd.f32 %v524_v0, %v455_v51  ;;  %v589_v21 = vmax.f32 %v523_v12, 0.0 }
 0x1e9   :  { %v528_v1 = vpop.f32.mrf.mxu1  ;;  %1055 = vmatmul.mubr.msk.bf16.vlgmr.msra.gmra.mxu1 %vm477_vm1, %v1117_v63 }
 0x1ea   :  { %810 = vmatprep.mubr.bf16.mxu1 %v1152_v3  ;;  %v529_v8 = vadd.f32 %v528_v1, %v460_v42  ;;  %v590_v14 = vmax.f32 %v525_v5, 0.0  ;;  %v602_v25 = vpack.c.bf16 %v589_v21, %v586_v24 }
 0x1eb   :  { %v530_v2 = vpop.f32.mrf.mxu1 }
 0x1ec   :  { %v531_v6 = vadd.f32 %v530_v2, %v460_v42  ;;  %v592_v18 = vmax.f32 %v529_v8, 0.0  ;;  %v603_v23 = vpack.c.bf16 %v590_v14, %v587_v19 }
 0x1ed   :  { %v532_v4 = vpop.f32.mrf.mxu1 }
 0x1ee   :  { %v533_v7 = vadd.f32 %v532_v4, %v465_v43  ;;  %v593_v15 = vmax.f32 %v531_v6, 0.0 }
 0x1ef   :  { %v534_v9 = vpop.f32.mrf.mxu1 }
 0x1f0   :  { %v535_v11 = vadd.f32 %v534_v9, %v465_v43  ;;  %v595_v13 = vmax.f32 %v533_v7, 0.0 }
 0x1f2   :  { %v596_v16 = vmax.f32 %v535_v11, 0.0  ;;  %v605_v22 = vpack.c.bf16 %v595_v13, %v592_v18 }
 0x1f4   :  { %v606_v20 = vpack.c.bf16 %v596_v16, %v593_v15 }
 0x1f6   :  { %660 = vmatprep.subr.bf16.mxu0 %v606_v20 }
 0x1f7   :  { %661 = vmatpush1.bf16.msra.mxu0 %v605_v22 }
 0x1f8   :  { %662 = vmatprep.subr.bf16.mxu0 %v603_v23 }
 0x1fb   :  { %663 = vmatpush1.bf16.msra.mxu0 %v602_v25 }
 0x1fc   :  { %1058 = vmatprep.subr.bf16.mxu0 %v1153_v26 }
 0x1fe   :  { %975 = vmatmul.mubr.msk.bf16.vlgmr.msra.gmra.mxu0 %vm477_vm1, %v1116_v41 }
 0x1ff   :  { %690 = vmatprep.mubr.bf16.mxu0 %v1152_v3 }
 0x206   :  { %976 = vmatmul.mubr.msk.bf16.gmra.mxu0 %vm477_vm1, %v1117_v63 }
 0x207   :  { %1062 = vmatprep.mubr.msk.bf16.mxu0 %vm1154_vm2, %v1153_v26 }
 0x2a9   :  { %v1056_v29 = vpop.f32.mrf.mxu1 }
 0x2aa   :  { %v744_v31 = vadd.f32 %v1056_v29, %v625_v27 }
 0x2ab   :  { %v735_v30 = vpop.f32.mrf.mxu1 }
 0x2ac   :  { %v758_v37 = vmax.f32 %v744_v31, 0.0  ;;  %v736_v38 = vadd.f32 %v735_v30, %v615_v33 }
 0x2ad   :  { %v1057_v32 = vpop.f32.mrf.mxu1 }
 0x2ae   :  { %v747_v34 = vadd.f32 %v1057_v32, %v630_v28  ;;  %v752_v42 = vmax.f32 %v736_v38, 0.0 }
 0x2af   :  { %v738_v36 = vpop.f32.mrf.mxu1 }
 0x2b0   :  { %v761_v39 = vmax.f32 %v747_v34, 0.0  ;;  %v739_v3 = vadd.f32 %v738_v36, %v620_v35 }
 0x2b2   :  { %v768_v40 = vpack.c.bf16 %v761_v39, %v758_v37  ;;  %v755_v41 = vmax.f32 %v739_v3, 0.0 }
 0x2b4   :  { %1059 = vmatpush3.bf16.msra.mxu0 %v768_v40  ;;  %v765_v43 = vpack.c.bf16 %v755_v41, %v752_v42 }
 0x2b5   :  { %1060 = vmatprep.subr.bf16.mxu0 %v1153_v26 }
 0x2b8   :  { %1061 = vmatpush3.bf16.msra.mxu0 %v765_v43 }
 0x2bb   :  { %1063 = vmatmul.mubr.msk.bf16.vlgmr.msra.gmra.mxu0 %vm477_vm1, %v762_v44 }
 0x2be   :  { %v682_v45 = vpop.f32.mrf.mxu0 }
 0x2bf   :  { %v683_v0 = vadd.f32 %v682_v45, %v615_v33 }
 0x2c0   :  { %v684_v46 = vpop.f32.mrf.mxu0 }
 0x2c1   :  { %v685_v57 = vadd.f32 %v684_v46, %v615_v33  ;;  %v750_v8 = vmax.f32 %v683_v0, 0.0 }
 0x2c2   :  { %v686_v47 = vpop.f32.mrf.mxu0 }
 0x2c3   :  { %v687_v59 = vadd.f32 %v686_v47, %v620_v35  ;;  %v751_v2 = vmax.f32 %v685_v57, 0.0 }
 0x2c4   :  { %v688_v48 = vpop.f32.mrf.mxu0 }
 0x2c5   :  { %v689_v52 = vadd.f32 %v688_v48, %v620_v35  ;;  %v753_v5 = vmax.f32 %v687_v59, 0.0 }
 0x2c6   :  { %v692_v49 = vpop.f32.mrf.mxu0 }
 0x2c7   :  { %v693_v55 = vadd.f32 %v692_v49, %v625_v27  ;;  %v754_v61 = vmax.f32 %v689_v52, 0.0  ;;  %v763_v9 = vpack.c.bf16 %v753_v5, %v750_v8 }
 0x2c8   :  { %v694_v50 = vpop.f32.mrf.mxu0 }
 0x2c9   :  { %v695_v53 = vadd.f32 %v694_v50, %v625_v27  ;;  %v756_v1 = vmax.f32 %v693_v55, 0.0  ;;  %v764_v7 = vpack.c.bf16 %v754_v61, %v751_v2 }
 0x2ca   :  { %v696_v51 = vpop.f32.mrf.mxu0 }
 0x2cb   :  { %v697_v54 = vadd.f32 %v696_v51, %v630_v28  ;;  %v757_v62 = vmax.f32 %v695_v53, 0.0 }
 0x2cc   :  { %v698_v56 = vpop.f32.mrf.mxu0 }
 0x2cd   :  { %v699_v58 = vadd.f32 %v698_v56, %v630_v28  ;;  %v759_v60 = vmax.f32 %v697_v54, 0.0 }
 0x2cf   :  { %v760_v63 = vmax.f32 %v699_v58, 0.0  ;;  %v766_v6 = vpack.c.bf16 %v759_v60, %v756_v1 }
 0x2d1   :  { %v767_v4 = vpack.c.bf16 %v760_v63, %v757_v62 }
 0x2d3   :  { %790 = vmatprep.subr.bf16.mxu1 %v767_v4 }
 0x2d4   :  { %791 = vmatpush1.bf16.msra.mxu1 %v766_v6 }
 0x2d5   :  { %792 = vmatprep.subr.bf16.mxu1 %v764_v7 }
 0x2d8   :  { %793 = vmatpush1.bf16.msra.mxu1 %v763_v9 }
 0x2db   :  { %979 = vmatmul.mubr.msk.bf16.vlgmr.msra.gmra.mxu1 %vm477_vm1, %v762_v44 }
 0x37b   :  { %v853_v11 = vpop.f32.mrf.mxu0 }
 0x37c   :  { %v854_v12 = vadd.f32 %v853_v11, %v773_v10 }
 0x37d   :  { %v1064_v13 = vpop.f32.mrf.mxu0 }
 0x37e   :  { %v874_v14 = vsel %vm859_vm3, %v854_v12, -inf }
 0x37f   :  { %v875_v15 = vrot.slane %v874_v14, 4  ;;  %v856_v16 = vpop.f32.mrf.mxu0 }
 0x381   :  { %v876_v17 = vmax.f32 %v874_v14, %v875_v15  ;;  %v1065_v18 = vpop.f32.mrf.mxu0 }
 0x383   :  { %v877_v19 = vrot.slane %v876_v17, 2 }
 0x385   :  { %v878_v20 = vmax.f32 %v876_v17, %v877_v19 }
 0x387   :  { %v879_v21 = vrot.slane %v878_v20, 1 }
 0x389   :  { %v880_v22 = vmax.f32 %v878_v20, %v879_v21 }
 0x38b   :  { %v883_v23 = vsub.f32 %v854_v12, %v880_v22 }
 0x38d   :  { %v888_v24 = vmul.f32 1.442695, %v883_v23 }
 0x38f   :  { %1118 = vpow2.f32 %v888_v24 }
 0x39b   :  { %v812_v25 = vpop.f32.mrf.mxu1 }
 0x39c   :  { %v1119_v26 = vpop.eup %1118  ;;  %v813_v27 = vadd.f32 %v812_v25, %v773_v10 }
 0x39d   :  { %v904_v28 = vsel %vm859_vm3, %v1119_v26, 0.0  ;;  %v814_v29 = vpop.f32.mrf.mxu1 }
 0x39e   :  { %v905_v30 = vrot.slane %v904_v28, 4  ;;  %v860_v31 = vsel %vm859_vm3, %v813_v27, -inf  ;;  %v815_v32 = vadd.f32 %v814_v29, %v773_v10 }
 0x39f   :  { %v861_v33 = vrot.slane %v860_v31, 4  ;;  %v816_v34 = vpop.f32.mrf.mxu1 }
 0x3a0   :  { %v906_v35 = vadd.f32 %v905_v30, %v904_v28  ;;  %v867_v36 = vsel %vm859_vm3, %v815_v32, -inf }
 0x3a1   :  { %v862_v37 = vmax.f32 %v860_v31, %v861_v33  ;;  %v868_v38 = vrot.slane %v867_v36, 4  ;;  %v817_v39 = vpop.f32.mrf.mxu1 }
 0x3a2   :  { %v907_v3 = vrot.slane %v906_v35, 2 }
 0x3a3   :  { %v863_v40 = vrot.slane %v862_v37, 2  ;;  %v869_v41 = vmax.f32 %v867_v36, %v868_v38 }
 0x3a4   :  { %v908_v42 = vadd.f32 %v907_v3, %v906_v35 }
 0x3a5   :  { %v864_v43 = vmax.f32 %v862_v37, %v863_v40  ;;  %v870_v44 = vrot.slane %v869_v41, 2 }
 0x3a6   :  { %v909_v45 = vrot.slane %v908_v42, 1 }
 0x3a7   :  { %v865_v46 = vrot.slane %v864_v43, 1  ;;  %v871_v47 = vmax.f32 %v869_v41, %v870_v44 }
 0x3a8   :  { %v910_v48 = vadd.f32 %v909_v45, %v908_v42 }
 0x3a9   :  { %v866_v49 = vmax.f32 %v864_v43, %v865_v46  ;;  %v872_v50 = vrot.slane %v871_v47, 1 }
 0x3aa   :  { %1120 = vrcp.f32 %v910_v48 }
 0x3ab   :  { %v881_v51 = vsub.f32 %v813_v27, %v866_v49  ;;  %v873_v52 = vmax.f32 %v871_v47, %v872_v50 }
 0x3ad   :  { %v884_v53 = vmul.f32 1.442695, %v881_v51  ;;  %v882_v54 = vsub.f32 %v815_v32, %v873_v52 }
 0x3af   :  { %1122 = vpow2.f32 %v884_v53  ;;  %v886_v55 = vmul.f32 1.442695, %v882_v54 }
 0x3b1   :  { %1124 = vpow2.f32 %v886_v55 }
 0x3b7   :  { %v1121_v56 = vpop.eup %1120 }
 0x3b8   :  { %v916_v57 = vmul.f32 %v1121_v56, %v1119_v26 }
 0x3ba   :  { %922 = vst [vmem:[#allocation2 + $0x8] sm:$0xf] %v916_v57 }
 0x3bc   :  { %v1123_v58 = vpop.eup %1122 }
 0x3bd   :  { %v890_v59 = vsel %vm859_vm3, %v1123_v58, 0.0 }
 0x3be   :  { %v1125_v60 = vpop.eup %1124  ;;  %v891_v61 = vrot.slane %v890_v59, 4 }
 0x3bf   :  { %v897_v62 = vsel %vm859_vm3, %v1125_v60, 0.0 }
 0x3c0   :  { %v892_v63 = vadd.f32 %v891_v61, %v890_v59  ;;  %v898_v0 = vrot.slane %v897_v62, 4 }
 0x3c2   :  { %v893_v1 = vrot.slane %v892_v63, 2  ;;  %v899_v2 = vadd.f32 %v898_v0, %v897_v62 }
 0x3c4   :  { %v894_v4 = vadd.f32 %v893_v1, %v892_v63  ;;  %v900_v5 = vrot.slane %v899_v2, 2 }
 0x3c6   :  { %v901_v6 = vadd.f32 %v900_v5, %v899_v2  ;;  %v895_v7 = vrot.slane %v894_v4, 1 }
 0x3c8   :  { %v896_v8 = vadd.f32 %v895_v7, %v894_v4  ;;  %v902_v9 = vrot.slane %v901_v6, 1 }
 0x3ca   :  { %v903_v10 = vadd.f32 %v902_v9, %v901_v6  ;;  %1126 = vrcp.f32 %v896_v8 }
 0x3cc   :  { %1128 = vrcp.f32 %v903_v10 }
 0x3d7   :  { %v1127_v11 = vpop.eup %1126 }
 0x3d8   :  { %v912_v13 = vmul.f32 %v1127_v11, %v1123_v58 }
 0x3d9   :  { %v1129_v12 = vpop.eup %1128 }
 0x3da   :  { %v914_v14 = vmul.f32 %v1129_v12, %v1125_v60 }
 0x3dc   :  { %v919_v15 = vcombine.low %v912_v13, %v914_v14 }
 0x3de   :  { %921 = vst [vmem:[#allocation2] sm:$0xff] %v919_v15 }
 0x3df   :  { %1141 = shalt.err (!%p1138_p4)
}
 0x3e0   :  { %932 = dma.vmem_to_hbm [thread:$0]  %s930_s4, 192, %s1416_s9, [#allocation3]  }
 0x3e1   :  { %1150 = dma.done.wait [#allocation3], 192  }
 0x3e2   :  { %1151 = vsyncadd [#allocation3], 4294967104 }
 0x3e3   :  { %936 = vsyncpa [#allocation3], 1 }

</bundles_post_ra>
